<compile_context>
chip_gen: v7x
topology: tpu7x:2x2x1
jax: 0.10.0
libtpu: 0.0.40
codegen_flags: <defaults>
</compile_context>

<pallas_src>
import jax
import jax.numpy as jnp
from jax import lax
from jax.experimental import pallas as pl
from jax.experimental.pallas import tpu as pltpu


def _bilstm_avg_kernel(emb_ref, wih_ref, whh_ref, b_ref, scale_ref,
                       wd_ref, bd_ref, out_ref, gx_ref):
    T, TB, E2 = emb_ref.shape
    H2 = whh_ref.shape[0]          # 2 * Hd : fused fwd+bwd hidden width
    G = 4 * H2                     # 8 * Hd : fused gate width (128 at Hd=16)
    cdt = wih_ref.dtype            # MXU operand dtype (bf16 or f32)

    # ---- hoisted input projection ------------------------------------------
    # One big MXU matmul for every timestep and BOTH directions.  Each emb row
    # is [x_t | x_{T-1-t}] and wih is block-diagonal over those halves, so the
    # backward-direction gate columns come out already time-reversed: no
    # per-step select / reversal inside the recurrence (perf review #2).
    emb2d = emb_ref[...].reshape(T * TB, E2)
    gx = jnp.dot(emb2d, wih_ref[...], preferred_element_type=jnp.float32)
    gx_ref[...] = (gx + b_ref[...]).astype(gx_ref.dtype)   # bias folded in
    # TODO(synk): software-pipeline this projection against the recurrence
    # (half-tile interleave / emit_pipeline, perf review #8).

    whh = whh_ref[...]             # block-diag (2Hd, 8Hd); loaded once
    # TODO(synk): keep whh resident in MXU weight registers across the T steps
    # via pltpu.matmul_push_rhs / matmul_acc_lhs (perf review #10).
    # TODO(synk): 4-batch-row lane packing for Hd=16 (128-lane recurrence,
    # perf review #4/#11) not implemented.

    def step(row, h, c, acc):
        gx_t = gx_ref[pl.ds(row, TB), :].astype(jnp.float32)   # (TB, 8Hd)
        gates = gx_t + jnp.dot(h.astype(cdt), whh,
                               preferred_element_type=jnp.float32)
        # One full-width sigmoid; the g-gate pre-activation was pre-scaled by 2
        # at pack time so tanh(x) == 2*sigmoid(2x) - 1 (perf review #3).
        s = jax.nn.sigmoid(gates)
        i = s[:, 0 * H2:1 * H2]
        f = s[:, 1 * H2:2 * H2]
        g = 2.0 * s[:, 2 * H2:3 * H2] - 1.0
        o = s[:, 3 * H2:4 * H2]
        c = f * c + i * g
        h = o * jnp.tanh(c)
        return h, c, acc + h

    h = jnp.zeros((TB, H2), jnp.float32)       # [h_fwd | h_bwd]
    c = jnp.zeros((TB, H2), jnp.float32)       # f32 cell state
    acc = jnp.zeros((TB, H2), jnp.float32)     # sum_t h_t (both directions)

    if T <= 32:
        # Full unroll: static gx slices + LLO scheduling visibility.
        for t in range(T):
            h, c, acc = step(t * TB, h, c, acc)
    else:
        # Bounded unroll for long sequences (perf review #9): keeps vreg
        # pressure and compile time in check.
        def body(t, carry):
            hh, cc, aa = carry
            row = t * TB
            if TB % 8 == 0:
                row = pl.multiple_of(row, 8)
            return step(row, hh, cc, aa)
        h, c, acc = lax.fori_loop(0, T, body, (h, c, acc), unroll=8)

    # AdaptiveAvgPool1d(1) over T followed by * (64/num):
    # scale_ref already holds 64 / (num * T) per batch row.
    pooled = acc * scale_ref[...]              # (TB, 2Hd)

    # dense: Dropout is identity at inference, then Linear(hidden, out_pad).
    # TODO(synk): training-mode dropout (random mask) not implemented.
    logits = (jnp.dot(pooled.astype(cdt), wd_ref[...],
                      preferred_element_type=jnp.float32) + bd_ref[...])
    out_ref[...] = logits.astype(out_ref.dtype)


def _pack_gatewise(w_f, w_b, hd):
    """Interleave per-gate column blocks of the two directions.

    Per-direction column layout is PyTorch LSTM order [i|f|g|o] (width hd);
    output layout is [i_f i_b | f_f f_b | g_f g_b | o_f o_b] (width 8*hd).
    """
    blocks = []
    for k in range(4):
        blocks.append(w_f[..., k * hd:(k + 1) * hd])
        blocks.append(w_b[..., k * hd:(k + 1) * hd])
    return jnp.concatenate(blocks, axis=-1)


def _tpu_generation():
    """(VMEM request budget, #TensorCores, default batch tile) for local TPU."""
    kind = ""
    try:
        kind = jax.devices()[0].device_kind.lower()
    except Exception:
        pass
    if "v7" in kind or "7x" in kind:        # 64 MiB VMEM / TC, 2 TCs
        return 44 << 20, 2, 256
    if "v5" in kind:                        # 128 MiB VMEM, 1 TC
        return 96 << 20, 1, 128
    return 96 << 20, 1, 256                 # v6e & unknown default


def _choose_tile(B, T, E2, G, H2, OUT_PAD, itm, gx_itm, batch_tile):
    """VMEM- and generation-aware batch tile + vmem_limit (reviews #1/5/6/7)."""
    budget, n_cores, default_tb = _tpu_generation()
    fixed = ((E2 * G + H2 * G + H2 * OUT_PAD) * itm    # packed weights
             + (G + OUT_PAD) * 4)                      # biases (f32)
    per_row = (T * G * gx_itm                          # gx scratch
               + 2 * T * max(E2, 128) * itm            # emb tiles (2 bufs, lane pad)
               + 2 * OUT_PAD * 4 + 2 * 4               # out + scale blocks (2 bufs)
               + 8 * G * 4)                            # h/c/acc/gate temps + slack

    tb = int(batch_tile) if batch_tile is not None else default_tb
    while tb > 8 and fixed + tb * per_row > int(0.55 * budget):
        tb //= 2
    if n_cores >= 2 and B >= 16:
        # Guarantee >=2 "parallel" grid steps so both TensorCores get work.
        half = ((-(-B // 2)) + 7) // 8 * 8
        tb = min(tb, max(8, half))
    if B <= tb:
        tb = B                       # single grid step: block == full batch dim
    else:
        tb = max(8, (tb // 8) * 8)   # multiple-of-8 tiles for multi-step grids
    b_pad = -(-B // tb) * tb
    vmem_limit = int(min(budget, max(int(1.8 * (fixed + tb * per_row)), 4 << 20)))
    return tb, b_pad, vmem_limit


def bilstm_forward(x_in, params, padding_idx=0, matmul_dtype=jnp.bfloat16,
                   batch_tile=None):
    """Plain-JAX glue (embedding gather, packing, scale) + fused Pallas kernel."""
    # TODO(synk): optional in-kernel DMA gather of embedding rows (scalar
    # prefetch of token ids) not implemented; the gather stays in XLA.
    emb = params["embedding"][x_in]                        # (B, T, E)
    B, T, E = emb.shape
    Hd = params["whh_f"].shape[0]
    H2 = 2 * Hd
    G = 4 * H2
    E2 = 2 * E
    out_size = params["wd"].shape[1]
    OUT_PAD = max(128, ((out_size + 127) // 128) * 128)

    # ---- time-aligned, direction-paired embeddings (review #2) --------------
    # Row t carries [x_t | x_{T-1-t}]; with the block-diagonal wih below this
    # yields direction-aligned gate pre-activations with no in-kernel reversal.
    # Time-major so the hoisted projection writes gx rows in step order.
    emb_pair = jnp.concatenate([emb, emb[:, ::-1, :]], axis=-1)       # (B, T, 2E)
    emb_tm = jnp.transpose(emb_pair, (1, 0, 2)).astype(matmul_dtype)  # (T, B, 2E)

    # ---- packed, direction-fused weights ------------------------------------
    zE = jnp.zeros_like(params["wih_f"])
    wih_p = jnp.concatenate(
        [_pack_gatewise(params["wih_f"], zE, Hd),     # rows 0:E   <- x_t
         _pack_gatewise(zE, params["wih_b"], Hd)],    # rows E:2E  <- x_{T-1-t}
        axis=0)                                       # (2E, 8Hd) block-diag
    zH = jnp.zeros_like(params["whh_f"])
    whh_p = jnp.concatenate(
        [_pack_gatewise(params["whh_f"], zH, Hd),     # rows 0:Hd   (h_fwd)
         _pack_gatewise(zH, params["whh_b"], Hd)],    # rows Hd:2Hd (h_bwd)
        axis=0)                                       # (2Hd, 8Hd) block-diag
    b_p = _pack_gatewise(params["b_f"], params["b_b"], Hd)            # (1, 8Hd)

    # Fold a x2 into the g-gate columns so tanh(x) == 2*sigmoid(2x) - 1 and the
    # kernel applies ONE full-width sigmoid per step (review #3).
    gscale = jnp.ones((G,), jnp.float32).at[2 * H2:3 * H2].set(2.0)
    wih_p = (wih_p * gscale).astype(matmul_dtype)
    whh_p = (whh_p * gscale).astype(matmul_dtype)
    b_p = (b_p * gscale).astype(jnp.float32)

    wd_p = jnp.pad(params["wd"], ((0, 0), (0, OUT_PAD - out_size))).astype(matmul_dtype)
    bd_p = jnp.pad(params["bd"], ((0, 0), (0, OUT_PAD - out_size))).astype(jnp.float32)

    # AdaptiveAvgPool1d(1) * (64/num) folded into a single per-row scale.
    mask = (x_in != padding_idx).astype(jnp.int32)
    num = jnp.sum(mask, axis=-1).astype(jnp.float32)
    num = jnp.maximum(num, 1.0)     # intended deviation: guard all-padding rows
    scale = (64.0 / (num * jnp.float32(T)))[:, None]      # (B, 1)

    # ---- generation/VMEM-aware batch tiling (reviews #1/#5/#6/#7) -----------
    itm = jnp.dtype(matmul_dtype).itemsize
    gx_dtype = (jnp.float32 if jnp.dtype(matmul_dtype) == jnp.dtype(jnp.float32)
                else jnp.bfloat16)
    gx_itm = jnp.dtype(gx_dtype).itemsize
    TB, B_pad, vmem_limit = _choose_tile(B, T, E2, G, H2, OUT_PAD, itm, gx_itm,
                                         batch_tile)
    if B_pad != B:
        emb_tm = jnp.pad(emb_tm, ((0, 0), (0, B_pad - B), (0, 0)))
        scale = jnp.pad(scale, ((0, B_pad - B), (0, 0)))

    out = pl.pallas_call(
        _bilstm_avg_kernel,
        out_shape=jax.ShapeDtypeStruct((B_pad, OUT_PAD), jnp.float32),
        grid=(B_pad // TB,),
        in_specs=[
            pl.BlockSpec((T, TB, E2), lambda i: (0, i, 0)),
            pl.BlockSpec(wih_p.shape, lambda i: (0, 0)),
            pl.BlockSpec(whh_p.shape, lambda i: (0, 0)),
            pl.BlockSpec(b_p.shape, lambda i: (0, 0)),
            pl.BlockSpec((TB, 1), lambda i: (i, 0)),
            pl.BlockSpec(wd_p.shape, lambda i: (0, 0)),
            pl.BlockSpec(bd_p.shape, lambda i: (0, 0)),
        ],
        out_specs=pl.BlockSpec((TB, OUT_PAD), lambda i: (i, 0)),
        scratch_shapes=[pltpu.VMEM((T * TB, G), gx_dtype)],
        compiler_params=pltpu.CompilerParams(
            dimension_semantics=("parallel",),
            vmem_limit_bytes=vmem_limit),
    )(emb_tm, wih_p, whh_p, b_p, scale, wd_p, bd_p)

    return out[:B, :out_size]


def reference_forward(x_in, params, padding_idx=0):
    """Pure-JAX (f32) reference mirroring the PyTorch forward (eval mode)."""
    emb = params["embedding"][x_in].astype(jnp.float32)
    B, T, _ = emb.shape
    Hd = params["whh_f"].shape[0]

    def run_dir(wih, whh, b, reverse):
        def step(carry, x_t):
            h, c = carry
            gates = x_t @ wih + h @ whh + b
            i = jax.nn.sigmoid(gates[:, :Hd])
            f = jax.nn.sigmoid(gates[:, Hd:2 * Hd])
            g = jnp.tanh(gates[:, 2 * Hd:3 * Hd])
            o = jax.nn.sigmoid(gates[:, 3 * Hd:])
            c = f * c + i * g
            h = o * jnp.tanh(c)
            return (h, c), h
        xs = jnp.swapaxes(emb, 0, 1)  # (T, B, E)
        init = (jnp.zeros((B, Hd), jnp.float32), jnp.zeros((B, Hd), jnp.float32))
        _, hs = lax.scan(step, init, xs, reverse=reverse)
        return jnp.swapaxes(hs, 0, 1)  # (B, T, Hd)

    out_f = run_dir(params["wih_f"], params["whh_f"], params["b_f"], False)
    out_b = run_dir(params["wih_b"], params["whh_b"], params["b_b"], True)
    lstm_out = jnp.concatenate([out_f, out_b], axis=-1)   # (B, T, 2*Hd)

    mask = (x_in != padding_idx).astype(jnp.int32)
    num = jnp.sum(mask, axis=-1).astype(jnp.float32)
    pooled = jnp.mean(lstm_out, axis=1) * (64.0 / num)[:, None]
    return pooled @ params["wd"] + params["bd"]


def init_params(key, vocab_size, output_size, embedding_size, hidden_size,
                padding_idx=0):
    Hd = hidden_size // 2
    s = 1.0 / float(Hd) ** 0.5
    ks = jax.random.split(key, 12)

    def u(k, shape):
        return jax.random.uniform(k, shape, jnp.float32, -s, s)

    emb = jax.random.normal(ks[0], (vocab_size, embedding_size), jnp.float32)
    emb = emb.at[padding_idx].set(0.0)   # nn.Embedding padding_idx row is zero

    # PyTorch LSTM weights are (4*Hd, in); we store transposes for x @ W.
    params = {
        "embedding": emb,
        "wih_f": u(ks[1], (embedding_size, 4 * Hd)),
        "whh_f": u(ks[2], (Hd, 4 * Hd)),
        "b_f":   u(ks[3], (1, 4 * Hd)) + u(ks[4], (1, 4 * Hd)),   # b_ih + b_hh
        "wih_b": u(ks[5], (embedding_size, 4 * Hd)),
        "whh_b": u(ks[6], (Hd, 4 * Hd)),
        "b_b":   u(ks[7], (1, 4 * Hd)) + u(ks[8], (1, 4 * Hd)),
        # dense Linear(hidden_size, output_size): stored transposed (H, out)
        "wd": u(ks[9], (hidden_size, output_size)),
        "bd": u(ks[10], (1, output_size)),
        # NOTE: self.query (512, hidden) is only used in 'attention' mode; unused here.
    }
    return params


if __name__ == "__main__":
    vocab_size, output_size = 100, 4
    embedding_size, hidden_size = 32, 32
    B, T = 2, 8
    padding_idx = 0

    key = jax.random.PRNGKey(0)
    k_param, k_ids = jax.random.split(key)
    params = init_params(k_param, vocab_size, output_size,
                         embedding_size, hidden_size, padding_idx)

    x_in = jax.random.randint(k_ids, (B, T), 1, vocab_size, dtype=jnp.int32)
    x_in = x_in.at[0, -2:].set(padding_idx)   # some padding tokens in row 0

    ref = jax.block_until_ready(reference_forward(x_in, params, padding_idx))

    # f32 path: tight check against the pure-JAX reference (the folded-x2
    # sigmoid identity for the g gate is exact up to fp rounding).
    out_f32 = jax.block_until_ready(
        bilstm_forward(x_in, params, padding_idx, matmul_dtype=jnp.float32))
    assert out_f32.shape == (B, output_size)
    assert jnp.allclose(out_f32, ref, rtol=5e-4, atol=5e-4), (out_f32, ref)

    # bf16 MXU-operand path (default perf config): looser tolerance vs f32 ref.
    out_bf16 = jax.block_until_ready(
        bilstm_forward(x_in, params, padding_idx, matmul_dtype=jnp.bfloat16))
    assert out_bf16.shape == (B, output_size)
    tol = 0.15 * (1.0 + float(jnp.max(jnp.abs(ref))))
    assert float(jnp.max(jnp.abs(out_bf16 - ref))) < tol, (out_bf16, ref)

    print("KERNEL_OK")
</pallas_src>

<mosaic_0001>
module attributes {stable_mosaic.version = 11 : i64} {
  func.func @_bilstm_avg_kernel(%arg0: i32, %arg1: memref<8x2x64xf32, #tpu.memory_space<vmem>>, %arg2: memref<64x128xf32, #tpu.memory_space<vmem>>, %arg3: memref<32x128xf32, #tpu.memory_space<vmem>>, %arg4: memref<1x128xf32, #tpu.memory_space<vmem>>, %arg5: memref<2x1xf32, #tpu.memory_space<vmem>>, %arg6: memref<32x128xf32, #tpu.memory_space<vmem>>, %arg7: memref<1x128xf32, #tpu.memory_space<vmem>>, %arg8: memref<2x128xf32, #tpu.memory_space<vmem>>, %arg9: memref<16x128xf32, #tpu.memory_space<vmem>>) attributes {dimension_semantics = [#tpu.dimension_semantics<parallel>], iteration_bounds = array<i64: 1>, scalar_prefetch = 0 : i64, scratch_operands = 1 : i64, tpu.core_type = #tpu.core_type<tc>, window_params = [{transform_indices = @transform_0, window_bounds = array<i64: 8, 2, 64>}, {pipeline_mode = #tpu.pipeline_mode<synchronous>, transform_indices = @transform_1, window_bounds = array<i64: 64, 128>}, {pipeline_mode = #tpu.pipeline_mode<synchronous>, transform_indices = @transform_2, window_bounds = array<i64: 32, 128>}, {pipeline_mode = #tpu.pipeline_mode<synchronous>, transform_indices = @transform_3, window_bounds = array<i64: 1, 128>}, {transform_indices = @transform_4, window_bounds = array<i64: 2, 1>}, {pipeline_mode = #tpu.pipeline_mode<synchronous>, transform_indices = @transform_5, window_bounds = array<i64: 32, 128>}, {pipeline_mode = #tpu.pipeline_mode<synchronous>, transform_indices = @transform_6, window_bounds = array<i64: 1, 128>}, {transform_indices = @transform_7, window_bounds = array<i64: 2, 128>}]} {
    %c0 = arith.constant 0 : index
    %c0_0 = arith.constant 0 : index
    %c0_1 = arith.constant 0 : index
    %0 = vector.load %arg1[%c0, %c0_0, %c0_1] : memref<8x2x64xf32, #tpu.memory_space<vmem>>, vector<8x2x64xf32>
    %1 = vector.shape_cast %0 : vector<8x2x64xf32> to vector<16x64xf32>
    %c0_2 = arith.constant 0 : index
    %c0_3 = arith.constant 0 : index
    %2 = vector.load %arg2[%c0_2, %c0_3] : memref<64x128xf32, #tpu.memory_space<vmem>>, vector<64x128xf32>
    %cst = arith.constant dense<0.000000e+00> : vector<16x128xf32>
    %3 = tpu.matmul %1, %2, %cst {dimension_numbers = #tpu.dot_dimension_numbers<[1], [0], [0], [1], [0, 0, 1, 1], [], []>} : vector<16x64xf32>, vector<64x128xf32>, vector<16x128xf32> -> vector<16x128xf32>
    %c0_4 = arith.constant 0 : index
    %c0_5 = arith.constant 0 : index
    %4 = vector.load %arg4[%c0_4, %c0_5] : memref<1x128xf32, #tpu.memory_space<vmem>>, vector<1x128xf32>
    %5 = vector.broadcast %4 : vector<1x128xf32> to vector<16x128xf32>
    %6 = arith.addf %3, %5 : vector<16x128xf32>
    %c0_6 = arith.constant 0 : index
    %c0_7 = arith.constant 0 : index
    %7 = vector.load %arg9[%c0_6, %c0_7] : memref<16x128xf32, #tpu.memory_space<vmem>>, vector<16x128xf32>
    tpu.vector_store %arg9[%c0_6, %c0_7], %6 {strides = array<i32>} : memref<16x128xf32, #tpu.memory_space<vmem>>, vector<16x128xf32>,
    %c0_8 = arith.constant 0 : index
    %c0_9 = arith.constant 0 : index
    %8 = vector.load %arg3[%c0_8, %c0_9] : memref<32x128xf32, #tpu.memory_space<vmem>>, vector<32x128xf32>
    %cst_10 = arith.constant 0.000000e+00 : f32
    %9 = vector.broadcast %cst_10 : f32 to vector<2x32xf32>
    %cst_11 = arith.constant 0.000000e+00 : f32
    %10 = vector.broadcast %cst_11 : f32 to vector<2x32xf32>
    %cst_12 = arith.constant 0.000000e+00 : f32
    %11 = vector.broadcast %cst_12 : f32 to vector<2x32xf32>
    %c0_13 = arith.constant 0 : index
    %c0_14 = arith.constant 0 : index
    %12 = vector.load %arg9[%c0_13, %c0_14] : memref<16x128xf32, #tpu.memory_space<vmem>>, vector<2x128xf32>
    %cst_15 = arith.constant dense<0.000000e+00> : vector<2x128xf32>
    %13 = tpu.matmul %9, %8, %cst_15 {dimension_numbers = #tpu.dot_dimension_numbers<[1], [0], [0], [1], [0, 0, 1, 1], [], []>} : vector<2x32xf32>, vector<32x128xf32>, vector<2x128xf32> -> vector<2x128xf32>
    %14 = arith.addf %12, %13 : vector<2x128xf32>
    %15 = arith.negf %14 : vector<2x128xf32>
    %16 = math.exp %15 : vector<2x128xf32>
    %cst_16 = arith.constant 1.000000e+00 : f32
    %17 = vector.broadcast %cst_16 : f32 to vector<2x128xf32>
    %18 = arith.addf %17, %16 : vector<2x128xf32>
    %19 = arith.divf %17, %18 : vector<2x128xf32>
    %20 = vector.extract_strided_slice %19 {offsets = [0, 0], sizes = [2, 32], strides = [1, 1]} : vector<2x128xf32> to vector<2x32xf32>
    %21 = vector.extract_strided_slice %19 {offsets = [0, 32], sizes = [2, 32], strides = [1, 1]} : vector<2x128xf32> to vector<2x32xf32>
    %22 = vector.extract_strided_slice %19 {offsets = [0, 64], sizes = [2, 32], strides = [1, 1]} : vector<2x128xf32> to vector<2x32xf32>
    %cst_17 = arith.constant 2.000000e+00 : f32
    %23 = vector.broadcast %cst_17 : f32 to vector<2x32xf32>
    %24 = arith.mulf %23, %22 : vector<2x32xf32>
    %cst_18 = arith.constant 1.000000e+00 : f32
    %25 = vector.broadcast %cst_18 : f32 to vector<2x32xf32>
    %26 = arith.subf %24, %25 : vector<2x32xf32>
    %27 = vector.extract_strided_slice %19 {offsets = [0, 96], sizes = [2, 32], strides = [1, 1]} : vector<2x128xf32> to vector<2x32xf32>
    %28 = arith.mulf %21, %10 : vector<2x32xf32>
    %29 = arith.mulf %20, %26 : vector<2x32xf32>
    %30 = arith.addf %28, %29 : vector<2x32xf32>
    %31 = math.tanh %30 : vector<2x32xf32>
    %32 = arith.mulf %27, %31 : vector<2x32xf32>
    %33 = arith.addf %11, %32 : vector<2x32xf32>
    %c2 = arith.constant 2 : index
    %c0_19 = arith.constant 0 : index
    %34 = vector.load %arg9[%c2, %c0_19] : memref<16x128xf32, #tpu.memory_space<vmem>>, vector<2x128xf32>
    %cst_20 = arith.constant dense<0.000000e+00> : vector<2x128xf32>
    %35 = tpu.matmul %32, %8, %cst_20 {dimension_numbers = #tpu.dot_dimension_numbers<[1], [0], [0], [1], [0, 0, 1, 1], [], []>} : vector<2x32xf32>, vector<32x128xf32>, vector<2x128xf32> -> vector<2x128xf32>
    %36 = arith.addf %34, %35 : vector<2x128xf32>
    %37 = arith.negf %36 : vector<2x128xf32>
    %38 = math.exp %37 : vector<2x128xf32>
    %cst_21 = arith.constant 1.000000e+00 : f32
    %39 = vector.broadcast %cst_21 : f32 to vector<2x128xf32>
    %40 = arith.addf %39, %38 : vector<2x128xf32>
    %41 = arith.divf %39, %40 : vector<2x128xf32>
    %42 = vector.extract_strided_slice %41 {offsets = [0, 0], sizes = [2, 32], strides = [1, 1]} : vector<2x128xf32> to vector<2x32xf32>
    %43 = vector.extract_strided_slice %41 {offsets = [0, 32], sizes = [2, 32], strides = [1, 1]} : vector<2x128xf32> to vector<2x32xf32>
    %44 = vector.extract_strided_slice %41 {offsets = [0, 64], sizes = [2, 32], strides = [1, 1]} : vector<2x128xf32> to vector<2x32xf32>
    %cst_22 = arith.constant 2.000000e+00 : f32
    %45 = vector.broadcast %cst_22 : f32 to vector<2x32xf32>
    %46 = arith.mulf %45, %44 : vector<2x32xf32>
    %cst_23 = arith.constant 1.000000e+00 : f32
    %47 = vector.broadcast %cst_23 : f32 to vector<2x32xf32>
    %48 = arith.subf %46, %47 : vector<2x32xf32>
    %49 = vector.extract_strided_slice %41 {offsets = [0, 96], sizes = [2, 32], strides = [1, 1]} : vector<2x128xf32> to vector<2x32xf32>
    %50 = arith.mulf %43, %30 : vector<2x32xf32>
    %51 = arith.mulf %42, %48 : vector<2x32xf32>
    %52 = arith.addf %50, %51 : vector<2x32xf32>
    %53 = math.tanh %52 : vector<2x32xf32>
    %54 = arith.mulf %49, %53 : vector<2x32xf32>
    %55 = arith.addf %33, %54 : vector<2x32xf32>
    %c4 = arith.constant 4 : index
    %c0_24 = arith.constant 0 : index
    %56 = vector.load %arg9[%c4, %c0_24] : memref<16x128xf32, #tpu.memory_space<vmem>>, vector<2x128xf32>
    %cst_25 = arith.constant dense<0.000000e+00> : vector<2x128xf32>
    %57 = tpu.matmul %54, %8, %cst_25 {dimension_numbers = #tpu.dot_dimension_numbers<[1], [0], [0], [1], [0, 0, 1, 1], [], []>} : vector<2x32xf32>, vector<32x128xf32>, vector<2x128xf32> -> vector<2x128xf32>
    %58 = arith.addf %56, %57 : vector<2x128xf32>
    %59 = arith.negf %58 : vector<2x128xf32>
    %60 = math.exp %59 : vector<2x128xf32>
    %cst_26 = arith.constant 1.000000e+00 : f32
    %61 = vector.broadcast %cst_26 : f32 to vector<2x128xf32>
    %62 = arith.addf %61, %60 : vector<2x128xf32>
    %63 = arith.divf %61, %62 : vector<2x128xf32>
    %64 = vector.extract_strided_slice %63 {offsets = [0, 0], sizes = [2, 32], strides = [1, 1]} : vector<2x128xf32> to vector<2x32xf32>
    %65 = vector.extract_strided_slice %63 {offsets = [0, 32], sizes = [2, 32], strides = [1, 1]} : vector<2x128xf32> to vector<2x32xf32>
    %66 = vector.extract_strided_slice %63 {offsets = [0, 64], sizes = [2, 32], strides = [1, 1]} : vector<2x128xf32> to vector<2x32xf32>
    %cst_27 = arith.constant 2.000000e+00 : f32
    %67 = vector.broadcast %cst_27 : f32 to vector<2x32xf32>
    %68 = arith.mulf %67, %66 : vector<2x32xf32>
    %cst_28 = arith.constant 1.000000e+00 : f32
    %69 = vector.broadcast %cst_28 : f32 to vector<2x32xf32>
    %70 = arith.subf %68, %69 : vector<2x32xf32>
    %71 = vector.extract_strided_slice %63 {offsets = [0, 96], sizes = [2, 32], strides = [1, 1]} : vector<2x128xf32> to vector<2x32xf32>
    %72 = arith.mulf %65, %52 : vector<2x32xf32>
    %73 = arith.mulf %64, %70 : vector<2x32xf32>
    %74 = arith.addf %72, %73 : vector<2x32xf32>
    %75 = math.tanh %74 : vector<2x32xf32>
    %76 = arith.mulf %71, %75 : vector<2x32xf32>
    %77 = arith.addf %55, %76 : vector<2x32xf32>
    %c6 = arith.constant 6 : index
    %c0_29 = arith.constant 0 : index
    %78 = vector.load %arg9[%c6, %c0_29] : memref<16x128xf32, #tpu.memory_space<vmem>>, vector<2x128xf32>
    %cst_30 = arith.constant dense<0.000000e+00> : vector<2x128xf32>
    %79 = tpu.matmul %76, %8, %cst_30 {dimension_numbers = #tpu.dot_dimension_numbers<[1], [0], [0], [1], [0, 0, 1, 1], [], []>} : vector<2x32xf32>, vector<32x128xf32>, vector<2x128xf32> -> vector<2x128xf32>
    %80 = arith.addf %78, %79 : vector<2x128xf32>
    %81 = arith.negf %80 : vector<2x128xf32>
    %82 = math.exp %81 : vector<2x128xf32>
    %cst_31 = arith.constant 1.000000e+00 : f32
    %83 = vector.broadcast %cst_31 : f32 to vector<2x128xf32>
    %84 = arith.addf %83, %82 : vector<2x128xf32>
    %85 = arith.divf %83, %84 : vector<2x128xf32>
    %86 = vector.extract_strided_slice %85 {offsets = [0, 0], sizes = [2, 32], strides = [1, 1]} : vector<2x128xf32> to vector<2x32xf32>
    %87 = vector.extract_strided_slice %85 {offsets = [0, 32], sizes = [2, 32], strides = [1, 1]} : vector<2x128xf32> to vector<2x32xf32>
    %88 = vector.extract_strided_slice %85 {offsets = [0, 64], sizes = [2, 32], strides = [1, 1]} : vector<2x128xf32> to vector<2x32xf32>
    %cst_32 = arith.constant 2.000000e+00 : f32
    %89 = vector.broadcast %cst_32 : f32 to vector<2x32xf32>
    %90 = arith.mulf %89, %88 : vector<2x32xf32>
    %cst_33 = arith.constant 1.000000e+00 : f32
    %91 = vector.broadcast %cst_33 : f32 to vector<2x32xf32>
    %92 = arith.subf %90, %91 : vector<2x32xf32>
    %93 = vector.extract_strided_slice %85 {offsets = [0, 96], sizes = [2, 32], strides = [1, 1]} : vector<2x128xf32> to vector<2x32xf32>
    %94 = arith.mulf %87, %74 : vector<2x32xf32>
    %95 = arith.mulf %86, %92 : vector<2x32xf32>
    %96 = arith.addf %94, %95 : vector<2x32xf32>
    %97 = math.tanh %96 : vector<2x32xf32>
    %98 = arith.mulf %93, %97 : vector<2x32xf32>
    %99 = arith.addf %77, %98 : vector<2x32xf32>
    %c8 = arith.constant 8 : index
    %c0_34 = arith.constant 0 : index
    %100 = vector.load %arg9[%c8, %c0_34] : memref<16x128xf32, #tpu.memory_space<vmem>>, vector<2x128xf32>
    %cst_35 = arith.constant dense<0.000000e+00> : vector<2x128xf32>
    %101 = tpu.matmul %98, %8, %cst_35 {dimension_numbers = #tpu.dot_dimension_numbers<[1], [0], [0], [1], [0, 0, 1, 1], [], []>} : vector<2x32xf32>, vector<32x128xf32>, vector<2x128xf32> -> vector<2x128xf32>
    %102 = arith.addf %100, %101 : vector<2x128xf32>
    %103 = arith.negf %102 : vector<2x128xf32>
    %104 = math.exp %103 : vector<2x128xf32>
    %cst_36 = arith.constant 1.000000e+00 : f32
    %105 = vector.broadcast %cst_36 : f32 to vector<2x128xf32>
    %106 = arith.addf %105, %104 : vector<2x128xf32>
    %107 = arith.divf %105, %106 : vector<2x128xf32>
    %108 = vector.extract_strided_slice %107 {offsets = [0, 0], sizes = [2, 32], strides = [1, 1]} : vector<2x128xf32> to vector<2x32xf32>
    %109 = vector.extract_strided_slice %107 {offsets = [0, 32], sizes = [2, 32], strides = [1, 1]} : vector<2x128xf32> to vector<2x32xf32>
    %110 = vector.extract_strided_slice %107 {offsets = [0, 64], sizes = [2, 32], strides = [1, 1]} : vector<2x128xf32> to vector<2x32xf32>
    %cst_37 = arith.constant 2.000000e+00 : f32
    %111 = vector.broadcast %cst_37 : f32 to vector<2x32xf32>
    %112 = arith.mulf %111, %110 : vector<2x32xf32>
    %cst_38 = arith.constant 1.000000e+00 : f32
    %113 = vector.broadcast %cst_38 : f32 to vector<2x32xf32>
    %114 = arith.subf %112, %113 : vector<2x32xf32>
    %115 = vector.extract_strided_slice %107 {offsets = [0, 96], sizes = [2, 32], strides = [1, 1]} : vector<2x128xf32> to vector<2x32xf32>
    %116 = arith.mulf %109, %96 : vector<2x32xf32>
    %117 = arith.mulf %108, %114 : vector<2x32xf32>
    %118 = arith.addf %116, %117 : vector<2x32xf32>
    %119 = math.tanh %118 : vector<2x32xf32>
    %120 = arith.mulf %115, %119 : vector<2x32xf32>
    %121 = arith.addf %99, %120 : vector<2x32xf32>
    %c10 = arith.constant 10 : index
    %c0_39 = arith.constant 0 : index
    %122 = vector.load %arg9[%c10, %c0_39] : memref<16x128xf32, #tpu.memory_space<vmem>>, vector<2x128xf32>
    %cst_40 = arith.constant dense<0.000000e+00> : vector<2x128xf32>
    %123 = tpu.matmul %120, %8, %cst_40 {dimension_numbers = #tpu.dot_dimension_numbers<[1], [0], [0], [1], [0, 0, 1, 1], [], []>} : vector<2x32xf32>, vector<32x128xf32>, vector<2x128xf32> -> vector<2x128xf32>
    %124 = arith.addf %122, %123 : vector<2x128xf32>
    %125 = arith.negf %124 : vector<2x128xf32>
    %126 = math.exp %125 : vector<2x128xf32>
    %cst_41 = arith.constant 1.000000e+00 : f32
    %127 = vector.broadcast %cst_41 : f32 to vector<2x128xf32>
    %128 = arith.addf %127, %126 : vector<2x128xf32>
    %129 = arith.divf %127, %128 : vector<2x128xf32>
    %130 = vector.extract_strided_slice %129 {offsets = [0, 0], sizes = [2, 32], strides = [1, 1]} : vector<2x128xf32> to vector<2x32xf32>
    %131 = vector.extract_strided_slice %129 {offsets = [0, 32], sizes = [2, 32], strides = [1, 1]} : vector<2x128xf32> to vector<2x32xf32>
    %132 = vector.extract_strided_slice %129 {offsets = [0, 64], sizes = [2, 32], strides = [1, 1]} : vector<2x128xf32> to vector<2x32xf32>
    %cst_42 = arith.constant 2.000000e+00 : f32
    %133 = vector.broadcast %cst_42 : f32 to vector<2x32xf32>
    %134 = arith.mulf %133, %132 : vector<2x32xf32>
    %cst_43 = arith.constant 1.000000e+00 : f32
    %135 = vector.broadcast %cst_43 : f32 to vector<2x32xf32>
    %136 = arith.subf %134, %135 : vector<2x32xf32>
    %137 = vector.extract_strided_slice %129 {offsets = [0, 96], sizes = [2, 32], strides = [1, 1]} : vector<2x128xf32> to vector<2x32xf32>
    %138 = arith.mulf %131, %118 : vector<2x32xf32>
    %139 = arith.mulf %130, %136 : vector<2x32xf32>
    %140 = arith.addf %138, %139 : vector<2x32xf32>
    %141 = math.tanh %140 : vector<2x32xf32>
    %142 = arith.mulf %137, %141 : vector<2x32xf32>
    %143 = arith.addf %121, %142 : vector<2x32xf32>
    %c12 = arith.constant 12 : index
    %c0_44 = arith.constant 0 : index
    %144 = vector.load %arg9[%c12, %c0_44] : memref<16x128xf32, #tpu.memory_space<vmem>>, vector<2x128xf32>
    %cst_45 = arith.constant dense<0.000000e+00> : vector<2x128xf32>
    %145 = tpu.matmul %142, %8, %cst_45 {dimension_numbers = #tpu.dot_dimension_numbers<[1], [0], [0], [1], [0, 0, 1, 1], [], []>} : vector<2x32xf32>, vector<32x128xf32>, vector<2x128xf32> -> vector<2x128xf32>
    %146 = arith.addf %144, %145 : vector<2x128xf32>
    %147 = arith.negf %146 : vector<2x128xf32>
    %148 = math.exp %147 : vector<2x128xf32>
    %cst_46 = arith.constant 1.000000e+00 : f32
    %149 = vector.broadcast %cst_46 : f32 to vector<2x128xf32>
    %150 = arith.addf %149, %148 : vector<2x128xf32>
    %151 = arith.divf %149, %150 : vector<2x128xf32>
    %152 = vector.extract_strided_slice %151 {offsets = [0, 0], sizes = [2, 32], strides = [1, 1]} : vector<2x128xf32> to vector<2x32xf32>
    %153 = vector.extract_strided_slice %151 {offsets = [0, 32], sizes = [2, 32], strides = [1, 1]} : vector<2x128xf32> to vector<2x32xf32>
    %154 = vector.extract_strided_slice %151 {offsets = [0, 64], sizes = [2, 32], strides = [1, 1]} : vector<2x128xf32> to vector<2x32xf32>
    %cst_47 = arith.constant 2.000000e+00 : f32
    %155 = vector.broadcast %cst_47 : f32 to vector<2x32xf32>
    %156 = arith.mulf %155, %154 : vector<2x32xf32>
    %cst_48 = arith.constant 1.000000e+00 : f32
    %157 = vector.broadcast %cst_48 : f32 to vector<2x32xf32>
    %158 = arith.subf %156, %157 : vector<2x32xf32>
    %159 = vector.extract_strided_slice %151 {offsets = [0, 96], sizes = [2, 32], strides = [1, 1]} : vector<2x128xf32> to vector<2x32xf32>
    %160 = arith.mulf %153, %140 : vector<2x32xf32>
    %161 = arith.mulf %152, %158 : vector<2x32xf32>
    %162 = arith.addf %160, %161 : vector<2x32xf32>
    %163 = math.tanh %162 : vector<2x32xf32>
    %164 = arith.mulf %159, %163 : vector<2x32xf32>
    %165 = arith.addf %143, %164 : vector<2x32xf32>
    %c14 = arith.constant 14 : index
    %c0_49 = arith.constant 0 : index
    %166 = vector.load %arg9[%c14, %c0_49] : memref<16x128xf32, #tpu.memory_space<vmem>>, vector<2x128xf32>
    %cst_50 = arith.constant dense<0.000000e+00> : vector<2x128xf32>
    %167 = tpu.matmul %164, %8, %cst_50 {dimension_numbers = #tpu.dot_dimension_numbers<[1], [0], [0], [1], [0, 0, 1, 1], [], []>} : vector<2x32xf32>, vector<32x128xf32>, vector<2x128xf32> -> vector<2x128xf32>
    %168 = arith.addf %166, %167 : vector<2x128xf32>
    %169 = arith.negf %168 : vector<2x128xf32>
    %170 = math.exp %169 : vector<2x128xf32>
    %cst_51 = arith.constant 1.000000e+00 : f32
    %171 = vector.broadcast %cst_51 : f32 to vector<2x128xf32>
    %172 = arith.addf %171, %170 : vector<2x128xf32>
    %173 = arith.divf %171, %172 : vector<2x128xf32>
    %174 = vector.extract_strided_slice %173 {offsets = [0, 0], sizes = [2, 32], strides = [1, 1]} : vector<2x128xf32> to vector<2x32xf32>
    %175 = vector.extract_strided_slice %173 {offsets = [0, 32], sizes = [2, 32], strides = [1, 1]} : vector<2x128xf32> to vector<2x32xf32>
    %176 = vector.extract_strided_slice %173 {offsets = [0, 64], sizes = [2, 32], strides = [1, 1]} : vector<2x128xf32> to vector<2x32xf32>
    %cst_52 = arith.constant 2.000000e+00 : f32
    %177 = vector.broadcast %cst_52 : f32 to vector<2x32xf32>
    %178 = arith.mulf %177, %176 : vector<2x32xf32>
    %cst_53 = arith.constant 1.000000e+00 : f32
    %179 = vector.broadcast %cst_53 : f32 to vector<2x32xf32>
    %180 = arith.subf %178, %179 : vector<2x32xf32>
    %181 = vector.extract_strided_slice %173 {offsets = [0, 96], sizes = [2, 32], strides = [1, 1]} : vector<2x128xf32> to vector<2x32xf32>
    %182 = arith.mulf %175, %162 : vector<2x32xf32>
    %183 = arith.mulf %174, %180 : vector<2x32xf32>
    %184 = arith.addf %182, %183 : vector<2x32xf32>
    %185 = math.tanh %184 : vector<2x32xf32>
    %186 = arith.mulf %181, %185 : vector<2x32xf32>
    %187 = arith.addf %165, %186 : vector<2x32xf32>
    %c0_54 = arith.constant 0 : index
    %c0_55 = arith.constant 0 : index
    %188 = vector.load %arg5[%c0_54, %c0_55] : memref<2x1xf32, #tpu.memory_space<vmem>>, vector<2x1xf32>
    %189 = vector.broadcast %188 : vector<2x1xf32> to vector<2x32xf32>
    %190 = arith.mulf %187, %189 : vector<2x32xf32>
    %c0_56 = arith.constant 0 : index
    %c0_57 = arith.constant 0 : index
    %191 = vector.load %arg6[%c0_56, %c0_57] : memref<32x128xf32, #tpu.memory_space<vmem>>, vector<32x128xf32>
    %cst_58 = arith.constant dense<0.000000e+00> : vector<2x128xf32>
    %192 = tpu.matmul %190, %191, %cst_58 {dimension_numbers = #tpu.dot_dimension_numbers<[1], [0], [0], [1], [0, 0, 1, 1], [], []>} : vector<2x32xf32>, vector<32x128xf32>, vector<2x128xf32> -> vector<2x128xf32>
    %c0_59 = arith.constant 0 : index
    %c0_60 = arith.constant 0 : index
    %193 = vector.load %arg7[%c0_59, %c0_60] : memref<1x128xf32, #tpu.memory_space<vmem>>, vector<1x128xf32>
    %194 = vector.broadcast %193 : vector<1x128xf32> to vector<2x128xf32>
    %195 = arith.addf %192, %194 : vector<2x128xf32>
    %c0_61 = arith.constant 0 : index
    %c0_62 = arith.constant 0 : index
    %196 = vector.load %arg8[%c0_61, %c0_62] : memref<2x128xf32, #tpu.memory_space<vmem>>, vector<2x128xf32>
    tpu.vector_store %arg8[%c0_61, %c0_62], %195 {strides = array<i32>} : memref<2x128xf32, #tpu.memory_space<vmem>>, vector<2x128xf32>,
    return
  }
  func.func @transform_0(%arg0: i32) -> (i32, i32, i32) {
    %c0_i32 = arith.constant 0 : i32
    %c0_i32_0 = arith.constant 0 : i32
    %c0_i32_1 = arith.constant 0 : i32
    return %c0_i32, %arg0, %c0_i32_0 : i32, i32, i32
  }
  func.func @transform_1(%arg0: i32) -> (i32, i32) {
    %c0_i32 = arith.constant 0 : i32
    %c0_i32_0 = arith.constant 0 : i32
    %c0_i32_1 = arith.constant 0 : i32
    return %c0_i32, %c0_i32_0 : i32, i32
  }
  func.func @transform_2(%arg0: i32) -> (i32, i32) {
    %c0_i32 = arith.constant 0 : i32
    %c0_i32_0 = arith.constant 0 : i32
    %c0_i32_1 = arith.constant 0 : i32
    return %c0_i32, %c0_i32_0 : i32, i32
  }
  func.func @transform_3(%arg0: i32) -> (i32, i32) {
    %c0_i32 = arith.constant 0 : i32
    %c0_i32_0 = arith.constant 0 : i32
    %c0_i32_1 = arith.constant 0 : i32
    return %c0_i32, %c0_i32_0 : i32, i32
  }
  func.func @transform_4(%arg0: i32) -> (i32, i32) {
    %c0_i32 = arith.constant 0 : i32
    %c0_i32_0 = arith.constant 0 : i32
    return %arg0, %c0_i32 : i32, i32
  }
  func.func @transform_5(%arg0: i32) -> (i32, i32) {
    %c0_i32 = arith.constant 0 : i32
    %c0_i32_0 = arith.constant 0 : i32
    %c0_i32_1 = arith.constant 0 : i32
    return %c0_i32, %c0_i32_0 : i32, i32
  }
  func.func @transform_6(%arg0: i32) -> (i32, i32) {
    %c0_i32 = arith.constant 0 : i32
    %c0_i32_0 = arith.constant 0 : i32
    %c0_i32_1 = arith.constant 0 : i32
    return %c0_i32, %c0_i32_0 : i32, i32
  }
  func.func @transform_7(%arg0: i32) -> (i32, i32) {
    %c0_i32 = arith.constant 0 : i32
    %c0_i32_0 = arith.constant 0 : i32
    return %arg0, %c0_i32 : i32, i32
  }
}

</mosaic_0001>

<bundles_post_ra>
// kernel: tpu_custom_call.1
= control target key start
LH: loop header
LB: loop body
LE: loop exit
PB: predicated region body
PF: predicated region fallthrough
CT: control target
= control target key end

     0   :  { %12 = vsyncpa [#allocation4], 0  ;;  %s1865_s0 = inlined_call_operand.hbm [shape: f32[8,2,64], index: 0, kind: input, shape index: {}]   ;;  %s1866_s1 = inlined_call_operand.hbm [shape: f32[64,128], index: 1, kind: input, shape index: {}]   ;;  %s1867_s2 = inlined_call_operand.hbm [shape: f32[32,128], index: 2, kind: input, shape index: {}]   ;;  %s1868_s3 = inlined_call_operand.vmem [shape: f32[1,128], index: 3, kind: input, shape index: {}]   ;;  %s1869_s4 = inlined_call_operand.vmem [shape: f32[2,1], index: 4, kind: input, shape index: {}]   ;;  %s1870_s5 = inlined_call_operand.hbm [shape: f32[32,128], index: 5, kind: input, shape index: {}]   ;;  %s1871_s6 = inlined_call_operand.vmem [shape: f32[1,128], index: 6, kind: input, shape index: {}]   ;;  %s1872_s7 = inlined_call_operand.hbm [shape: f32[2,128], index: 7, kind: output, shape index: {}]  }
   0x1   :  { %13 = vsyncpa [#allocation7], 0 }
   0x2   :  { %14 = vsyncpa [#allocation10], 0 }
   0x3   :  { %15 = vsyncpa [#allocation5], 0  ;;  %s1620_s24 = smov [#allocation6]   ;;  %s1502_s28 = scalar_lea.hbm %s1866_s1, 1024 }
   0x4   :  { %s33_s25 = sshll.u32 %s1620_s24, 4  ;;  %p1503_p0 = scmp.ne.s32.totalorder %s1866_s1, %s1502_s28  ;;  %s34_s25 = int_to_ptr.vmem [resolvable:$true] %s33_s25 }
   0x5   :  { %p1506_p1 = scmp.lt.u32.totalorder %s1502_s28, %s1866_s1 }
   0x7   :  { %p1508_p2 = pnand %p1506_p1, %p1503_p0 }
   0x9   :  { %1511 = shalt.err (!%p1508_p2)
}
   0xa   :  { %s1512_s10 = scalar_lea.vmem %s34_s25, 1024  ;;  %p1517_p4 = scmp.lt.s32.totalorder %s34_s25, %s34_s25 }
   0xb   :  { %p1513_p3 = scmp.ne.s32.totalorder %s34_s25, %s1512_s10  ;;  %p1518_p5 = scmp.lt.s32.totalorder %s1512_s10, %s1512_s10 }
   0xd   :  { %p1519_p6 = por %p1518_p5, %p1517_p4 }
   0xf   :  { %p1520_p7 = pnand %p1519_p6, %p1513_p3 }
  0x11   :  { %1523 = shalt.err (!%p1520_p7)
}
  0x12   :  { %s1621_s11 = smov 128   ;;  %s1622_s12 = smov 8  }
  0x13   :  { %39 = dma.hbm_to_vmem [thread:$0]  %s1866_s1, 1024, %s34_s25, [#allocation7], %s1621_s11, %s1621_s11, %s1622_s12  }
  0x14   :  { %s1623_s15 = smov [#allocation3]   ;;  %s1524_s19 = scalar_lea.hbm %s1865_s0, 256 }
  0x15   :  { %s21_s16 = sshll.u32 %s1623_s15, 4  ;;  %p1525_p8 = scmp.ne.s32.totalorder %s1865_s0, %s1524_s19  ;;  %s22_s16 = int_to_ptr.vmem [resolvable:$true] %s21_s16 }
  0x16   :  { %p1528_p9 = scmp.lt.u32.totalorder %s1524_s19, %s1865_s0 }
  0x18   :  { %p1530_p10 = pnand %p1528_p9, %p1525_p8 }
  0x1a   :  { %1533 = shalt.err (!%p1530_p10)
}
  0x1b   :  { %s1534_s24 = scalar_lea.vmem %s22_s16, 256  ;;  %p1539_p12 = scmp.lt.s32.totalorder %s22_s16, %s22_s16 }
  0x1c   :  { %p1535_p11 = scmp.ne.s32.totalorder %s22_s16, %s1534_s24  ;;  %p1540_p13 = scmp.lt.s32.totalorder %s1534_s24, %s1534_s24 }
  0x1e   :  { %p1541_p0 = por %p1540_p13, %p1539_p12 }
  0x20   :  { %p1542_p1 = pnand %p1541_p0, %p1535_p11 }
  0x22   :  { %1545 = shalt.err (!%p1542_p1)
}
  0x23   :  { %s1624_s1 = smov 32   ;;  %s1625_s25 = smov 2  }
  0x24   :  { %27 = dma.hbm_to_vmem [thread:$0]  %s1865_s0, 256, %s22_s16, [#allocation4], %s1624_s1, %s1624_s1, %s1625_s25  }
  0x25   :  { %s1626_s28 = smov [#allocation8]   ;;  %s1627_s30 = smov [#allocation9]  }
  0x26   :  { %s45_s29 = sshll.u32 %s1626_s28, 4  ;;  %s61_s8 = sshll.u32 %s1627_s30, 4  ;;  %s46_s29 = int_to_ptr.vmem [resolvable:$true] %s45_s29  ;;  %s1704_s8 = int_to_ptr.vmem [resolvable:$true] %s61_s8 }
  0x27   :  { %s1546_s13 = scalar_lea.hbm %s1867_s2, 512 }
  0x28   :  { %p1547_p2 = scmp.ne.s32.totalorder %s1867_s2, %s1546_s13  ;;  %p1550_p3 = scmp.lt.u32.totalorder %s1546_s13, %s1867_s2 }
  0x2a   :  { %p1552_p4 = pnand %p1550_p3, %p1547_p2 }
  0x2c   :  { %1555 = shalt.err (!%p1552_p4)
}
  0x2d   :  { %s1556_s0 = scalar_lea.vmem %s46_s29, 512  ;;  %p1561_p6 = scmp.lt.s32.totalorder %s46_s29, %s46_s29 }
  0x2e   :  { %p1557_p5 = scmp.ne.s32.totalorder %s46_s29, %s1556_s0  ;;  %p1562_p7 = scmp.lt.s32.totalorder %s1556_s0, %s1556_s0 }
  0x30   :  { %p1563_p8 = por %p1562_p7, %p1561_p6 }
  0x32   :  { %p1564_p9 = pnand %p1563_p8, %p1557_p5 }
  0x34   :  { %1567 = shalt.err (!%p1564_p9)
}
  0x35   :  { %51 = dma.hbm_to_vmem [thread:$0]  %s1867_s2, 512, %s46_s29, [#allocation7], %s1621_s11, %s1621_s11, %s1622_s12  }
  0x36   :  { %s1568_s22 = scalar_lea.hbm %s1870_s5, 512 }
  0x37   :  { %p1569_p10 = scmp.ne.s32.totalorder %s1870_s5, %s1568_s22  ;;  %p1572_p11 = scmp.lt.u32.totalorder %s1568_s22, %s1870_s5 }
  0x39   :  { %p1574_p12 = pnand %p1572_p11, %p1569_p10 }
  0x3b   :  { %1577 = shalt.err (!%p1574_p12)
}
  0x3c   :  { %s1578_s27 = scalar_lea.vmem %s1704_s8, 512  ;;  %p1583_p0 = scmp.lt.s32.totalorder %s1704_s8, %s1704_s8 }
  0x3d   :  { %p1579_p13 = scmp.ne.s32.totalorder %s1704_s8, %s1578_s27  ;;  %p1584_p1 = scmp.lt.s32.totalorder %s1578_s27, %s1578_s27 }
  0x3f   :  { %p1585_p2 = por %p1584_p1, %p1583_p0 }
  0x41   :  { %p1586_p3 = pnand %p1585_p2, %p1579_p13 }
  0x43   :  { %1589 = shalt.err (!%p1586_p3)
}
  0x44   :  { %67 = dma.hbm_to_vmem [thread:$0]  %s1870_s5, 512, %s1704_s8, [#allocation10], %s1621_s11, %s1621_s11, %s1622_s12  }
  0x45   :  { %1612 = dma.done.wait [#allocation4], 256  }
  0x46   :  { %1613 = vsyncadd [#allocation4], 4294967040 }
  0x47   :  { %1614 = dma.done.wait [#allocation7], 1536  }
  0x48   :  { %1615 = vsyncadd [#allocation7], 4294965760 }
  0x49   :  { %1616 = dma.done.wait [#allocation10], 512  }
  0x4a   :  { %1617 = vsyncadd [#allocation10], 4294966784  ;;  %v1628_v0 = vmov 1983009808   ;;  %v118_v2 = vlaneseq  ;;  %v1629_v3 = vmov 0.0|0.0   ;;  %vm1630_vm0 = vmmov 0  }
  0x4b   :  { %v116_v1 = vunpack.c.l.s4 %v1628_v0  ;;  %1384 = vmatprep.subr.bf16.mxu1 %v1629_v3  ;;  %v1631_v4 = vmov 0.0   ;;  %v90_v7 = vld [vmem:[#allocation6] sm:$0xff]  ;;  %v91_v8 = vld [vmem:[#allocation6 + $0x8] sm:$0xff]  ;;  %v92_v9 = vld [vmem:[#allocation6 + $0x10] sm:$0xff]  ;;  %vm147_vm1 = vcmask 523264   ;;  %s1632_s12 = smov 64  }
  0x4c   :  { %1277 = vmatprep.mubr.msk.f32.mxu1 %vm1630_vm0, %v1631_v4  ;;  %v119_v6 = vshrl.u32 %v118_v2, 7  ;;  %v1368_v10 = vpack.c.bf16 %v91_v8, %v90_v7  ;;  %v93_v11 = vld [vmem:[#allocation6 + $0x18] sm:$0xff]  ;;  %v94_v13 = vld [vmem:[#allocation6 + $0x20] sm:$0xff]  ;;  %v95_v14 = vld [vmem:[#allocation6 + $0x28] sm:$0xff]  ;;  %vm234_vm2 = vcmask 261120   ;;  %s1634_s8 = smov [#allocation11]  }
  0x4d   :  { %v117_v5 = vunpack.c.0.s8 %v116_v1  ;;  %v1372_v12 = vpack.c.bf16 %v93_v11, %v92_v9  ;;  %v82_v15 = vld [vmem:[#allocation3] sm:$0x3]  ;;  %v83_v17 = vld [vmem:[#allocation3 + $0x2] sm:$0x3]  ;;  %v84_v18 = vld [vmem:[#allocation3 + $0x4] sm:$0x3]  ;;  %v1376_v26 = vpack.c.bf16 %v95_v14, %v94_v13 }
  0x4e   :  { %1369 = vmatprep.subr.bf16.mxu0 %v1368_v10  ;;  %v85_v19 = vld [vmem:[#allocation3 + $0x6] sm:$0x3]  ;;  %v113_v21 = vcombine.low %v82_v15, %v83_v17  ;;  %v86_v23 = vld [vmem:[#allocation3 + $0x8] sm:$0x3]  ;;  %v87_v24 = vld [vmem:[#allocation3 + $0xa] sm:$0x3] }
  0x4f   :  { %v120_v16 = vsub.s32 %v117_v5, %v119_v6  ;;  %1371 = vmatpush3.bf16.msra.mxu0 %v1368_v10  ;;  %v96_v20 = vld [vmem:[#allocation6 + $0x30] sm:$0xff]  ;;  %v114_v22 = vcombine.low %v84_v18, %v85_v19  ;;  %v88_v25 = vld [vmem:[#allocation3 + $0xc] sm:$0x3]  ;;  %v89_v27 = vld [vmem:[#allocation3 + $0xe] sm:$0x3]  ;;  %v130_v36 = vcombine.low %v86_v23, %v87_v24  ;;  %s1156_s9 = sshll.u32 %s1634_s8, 4  ;;  %s1157_s9 = int_to_ptr.vmem [resolvable:$true] %s1156_s9 }
  0x50   :  { %1373 = vmatprep.subr.bf16.mxu0 %v1372_v12  ;;  %v229_v28 = vld [vmem:[#allocation8] sm:$0xff]  ;;  %v230_v29 = vld [vmem:[#allocation8 + $0x8] sm:$0xff]  ;;  %v97_v30 = vld [vmem:[#allocation6 + $0x38] sm:$0xff]  ;;  %v131_v37 = vcombine.low %v88_v25, %v89_v27  ;;  %s1590_s10 = scalar_lea.vmem %s1157_s9, 32  ;;  %p1595_p5 = scmp.lt.s32.totalorder %s1157_s9, %s1157_s9 }
  0x51   :  { %v121_v31 = vrot.slane %v113_v21, %v120_v16  ;;  %v128_v32 = vrot.slane %v114_v22, %v120_v16  ;;  %v1744_v33 = vpack.c.bf16 %v230_v29, %v229_v28  ;;  %v231_v34 = vld [vmem:[#allocation8 + $0x10] sm:$0xff]  ;;  %v232_v35 = vld [vmem:[#allocation8 + $0x18] sm:$0xff]  ;;  %v1380_v40 = vpack.c.bf16 %v97_v30, %v96_v20  ;;  %v1167_v46 = vld [vmem:[%s1868_s3] ss:$0 sm:$0xff]  ;;  %p1591_p4 = scmp.ne.s32.totalorder %s1157_s9, %s1590_s10  ;;  %p1596_p6 = scmp.lt.s32.totalorder %s1590_s10, %s1590_s10 }
  0x52   :  { %v1747_v39 = vpack.c.bf16 %v232_v35, %v231_v34  ;;  %v138_v41 = vrot.slane %v130_v36, %v120_v16  ;;  %v145_v42 = vrot.slane %v131_v37, %v120_v16 }
  0x53   :  { %1375 = vmatpush3.bf16.msra.mxu0 %v1372_v12  ;;  %v129_v38 = vcombine.low %v121_v31, %v128_v32  ;;  %1386 = vmatpush3.bf16.msra.mxu1 %v1744_v33  ;;  %p1597_p7 = por %p1596_p6, %p1595_p5 }
  0x54   :  { %1377 = vmatprep.subr.bf16.mxu0 %v1376_v26  ;;  %1387 = vmatprep.subr.bf16.mxu1 %v1629_v3  ;;  %v146_v43 = vcombine.low %v138_v41, %v145_v42 }
  0x55   :  { %1266 = vmatprep.mubr.msk.f32.mxu0 %vm147_vm1, %v129_v38  ;;  %p1598_p8 = pnand %p1597_p7, %p1591_p4 }
  0x57   :  { %1379 = vmatpush3.bf16.msra.mxu0 %v1376_v26  ;;  %1389 = vmatpush3.bf16.msra.mxu1 %v1747_v39 }
  0x58   :  { %1381 = vmatprep.subr.bf16.mxu0 %v1380_v40  ;;  %1390 = vmatprep.subr.bf16.mxu1 %v1629_v3 }
  0x5a   :  { %1278 = vmatmul.mubr.f32.vlgmr.msra.gmra.mrb[0].mxu1 %v1631_v4 }
  0x5b   :  { %1383 = vmatpush3.bf16.msra.mxu0 %v1380_v40  ;;  %1392 = vmatpush3.bf16.msra.mxu1 %v1744_v33 }
  0x5c   :  { %1393 = vmatprep.subr.bf16.mxu1 %v1629_v3  ;;  %1288 = vmatprep.mubr.msk.f32.mxu1 %vm1630_vm0, %v1631_v4 }
  0x5d   :  { %1396 = vmatprep.subr.bf16.mxu0 %v1629_v3 }
  0x5e   :  { %1267 = vmatmul.mubr.msk.f32.vlgmr.msra.gmra.mrb[0].mxu0 %vm147_vm1, %v146_v43 }
  0x5f   :  { %1395 = vmatpush3.bf16.msra.mxu1 %v1747_v39  ;;  %1398 = vmatpush3.bf16.msra.mxu0 %v1744_v33 }
  0x60   :  { %1399 = vmatprep.subr.bf16.mxu0 %v1629_v3  ;;  %1299 = vmatprep.mubr.msk.f32.mxu0 %vm1630_vm0, %v1631_v4 }
  0x61   :  { %1402 = vmatprep.subr.bf16.mxu1 %v1629_v3 }
  0x63   :  { %1401 = vmatpush3.bf16.msra.mxu0 %v1747_v39 }
  0x64   :  { %1408 = vmatprep.subr.bf16.mxu0 %v1629_v3 }
 0x12d   :  { %v304_v44 = vpop.f32.mrb[0].mxu1 }
 0x12e   :  { %v1279_v45 = vpop.f32.mrb[1].mxu1 }
 0x131   :  { %v1268_v47 = vpop.f32.mrb[0].mxu0 }
 0x132   :  { %v224_v48 = vadd.f32 %v1268_v47, %v1167_v46  ;;  %v218_v49 = vpop.f32.mrb[1].mxu0 }
 0x133   :  { %v219_v50 = vadd.f32 %v1167_v46, %v218_v49 }
 0x134   :  { %228 = vst [vmem:[#allocation2 + $0x8] sm:$0xff] %v224_v48 }
 0x135   :  { %227 = vst [vmem:[#allocation2] sm:$0xff] %v219_v50 }
 0x13c   :  { %v233_v51 = vld [vmem:[#allocation2] sm:$0x3]  ;;  %v335_v6 = vld [vmem:[#allocation2 + $0x2] sm:$0x3]  ;;  %v438_v25 = vld [vmem:[#allocation2 + $0x4] sm:$0x3] }
 0x13d   :  { %v308_v52 = vadd.f32 %v304_v44, %v233_v51  ;;  %v541_v48 = vld [vmem:[#allocation2 + $0x6] sm:$0x3] }
 0x13f   :  { %v1170_v53 = vmul.f32 -1.442695, %v308_v52 }
 0x141   :  { %1454 = vpow2.f32 %v1170_v53 }
 0x14b   :  { %v1455_v54 = vpop.eup %1454 }
 0x14c   :  { %v312_v55 = vadd.f32 1.0, %v1455_v54 }
 0x14e   :  { %1456 = vrcp.f32 %v312_v55 }
 0x158   :  { %v1457_v56 = vpop.eup %1456 }
 0x159   :  { %v315_v57 = vmul.f32 2.0, %v1457_v56  ;;  %v317_v61 = vmul.f32 0.0, %v1457_v56 }
 0x15b   :  { %v1171_v58 = vadd.f32 -1.0, %v315_v57 }
 0x15d   :  { %319 = vrot.lane.b32.xlu0 %v1171_v58, %s1632_s12 }
 0x1cf   :  { %v320_v59 = vpop.permute.xlu0 %319 }
 0x1d0   :  { %v322_v60 = vmul.f32 %v1457_v56, %v320_v59 }
 0x1d2   :  { %324 = vrot.lane.b32.xlu0 %v322_v60, %s1624_s1 }
 0x244   :  { %v325_v62 = vpop.permute.xlu0 %324 }
 0x245   :  { %v327_v63 = vadd.f32 %v325_v62, %v317_v61 }
 0x247   :  { %1458 = vtanh.f32 %v327_v63 }
 0x251   :  { %v1459_v0 = vpop.eup %1458 }
 0x252   :  { %330 = vrot.lane.b32.xlu1 %v1459_v0, %s1632_s12 }
 0x2c4   :  { %v331_v1 = vpop.permute.xlu1 %330 }
 0x2c5   :  { %v1774_v2 = vmul.f32 %v1457_v56, %v331_v1 }
 0x2c7   :  { %337 = vrot.lane.b32.xlu1 %v1774_v2, %s1624_s1 }
 0x339   :  { %v338_v5 = vpop.permute.xlu1 %337 }
 0x33a   :  { %1289 = vmatmul.mubr.msk.f32.vlgmr.msra.gmra.mrb[2].mxu1 %vm234_vm2, %v338_v5 }
 0x33b   :  { %1404 = vmatpush3.bf16.msra.mxu1 %v1744_v33  ;;  %1310 = vmatprep.mubr.msk.f32.mxu1 %vm1630_vm0, %v1631_v4 }
 0x33c   :  { %1405 = vmatprep.subr.bf16.mxu1 %v1629_v3 }
 0x33f   :  { %1407 = vmatpush3.bf16.msra.mxu1 %v1747_v39 }
 0x340   :  { %1414 = vmatprep.subr.bf16.mxu1 %v1629_v3 }
 0x40d   :  { %v407_v7 = vpop.f32.mrb[2].mxu1 }
 0x40e   :  { %v411_v8 = vadd.f32 %v407_v7, %v335_v6  ;;  %v1290_v9 = vpop.f32.mrb[3].mxu1  ;;  %v644_v6 = vld [vmem:[#allocation2 + $0x8] sm:$0x3] }
 0x410   :  { %v1173_v10 = vmul.f32 -1.442695, %v411_v8 }
 0x412   :  { %1460 = vpow2.f32 %v1173_v10 }
 0x41c   :  { %v1461_v11 = vpop.eup %1460 }
 0x41d   :  { %v415_v12 = vadd.f32 1.0, %v1461_v11 }
 0x41f   :  { %1462 = vrcp.f32 %v415_v12 }
 0x429   :  { %v1463_v13 = vpop.eup %1462 }
 0x42a   :  { %v418_v14 = vmul.f32 2.0, %v1463_v13  ;;  %v420_v18 = vmul.f32 %v1463_v13, %v327_v63 }
 0x42c   :  { %v1174_v15 = vadd.f32 -1.0, %v418_v14 }
 0x42e   :  { %422 = vrot.lane.b32.xlu0 %v1174_v15, %s1632_s12 }
 0x4a0   :  { %v423_v16 = vpop.permute.xlu0 %422 }
 0x4a1   :  { %v425_v17 = vmul.f32 %v1463_v13, %v423_v16 }
 0x4a3   :  { %427 = vrot.lane.b32.xlu1 %v425_v17, %s1624_s1 }
 0x515   :  { %v428_v19 = vpop.permute.xlu1 %427 }
 0x516   :  { %v430_v20 = vadd.f32 %v428_v19, %v420_v18 }
 0x518   :  { %1464 = vtanh.f32 %v430_v20 }
 0x522   :  { %v1465_v21 = vpop.eup %1464 }
 0x523   :  { %433 = vrot.lane.b32.xlu0 %v1465_v21, %s1632_s12 }
 0x595   :  { %v434_v22 = vpop.permute.xlu0 %433 }
 0x596   :  { %v436_v23 = vmul.f32 %v1463_v13, %v434_v22 }
 0x598   :  { %440 = vrot.lane.b32.xlu1 %v436_v23, %s1624_s1  ;;  %v437_v44 = vadd.f32 %v436_v23, %v1774_v2 }
 0x60a   :  { %v441_v24 = vpop.permute.xlu1 %440 }
 0x60b   :  { %1300 = vmatmul.mubr.msk.f32.vlgmr.msra.gmra.mrb[2].mxu0 %vm234_vm2, %v441_v24 }
 0x60c   :  { %1410 = vmatpush3.bf16.msra.mxu0 %v1744_v33  ;;  %1321 = vmatprep.mubr.msk.f32.mxu0 %vm1630_vm0, %v1631_v4 }
 0x60d   :  { %1411 = vmatprep.subr.bf16.mxu0 %v1629_v3 }
 0x610   :  { %1413 = vmatpush3.bf16.msra.mxu0 %v1747_v39 }
 0x611   :  { %1420 = vmatprep.subr.bf16.mxu0 %v1629_v3 }
 0x6de   :  { %v510_v26 = vpop.f32.mrb[2].mxu0 }
 0x6df   :  { %v514_v27 = vadd.f32 %v510_v26, %v438_v25  ;;  %v1301_v28 = vpop.f32.mrb[3].mxu0  ;;  %v747_v26 = vld [vmem:[#allocation2 + $0xa] sm:$0x3] }
 0x6e1   :  { %v1176_v29 = vmul.f32 -1.442695, %v514_v27 }
 0x6e3   :  { %1466 = vpow2.f32 %v1176_v29 }
 0x6ed   :  { %v1467_v30 = vpop.eup %1466 }
 0x6ee   :  { %v518_v31 = vadd.f32 1.0, %v1467_v30 }
 0x6f0   :  { %1468 = vrcp.f32 %v518_v31 }
 0x6fa   :  { %v1469_v32 = vpop.eup %1468 }
 0x6fb   :  { %v521_v34 = vmul.f32 2.0, %v1469_v32  ;;  %v523_v38 = vmul.f32 %v1469_v32, %v430_v20 }
 0x6fd   :  { %v1177_v35 = vadd.f32 -1.0, %v521_v34 }
 0x6ff   :  { %525 = vrot.lane.b32.xlu0 %v1177_v35, %s1632_s12 }
 0x771   :  { %v526_v36 = vpop.permute.xlu0 %525 }
 0x772   :  { %v528_v37 = vmul.f32 %v1469_v32, %v526_v36 }
 0x774   :  { %530 = vrot.lane.b32.xlu1 %v528_v37, %s1624_s1 }
 0x7e6   :  { %v531_v40 = vpop.permute.xlu1 %530 }
 0x7e7   :  { %v533_v41 = vadd.f32 %v531_v40, %v523_v38 }
 0x7e9   :  { %1470 = vtanh.f32 %v533_v41 }
 0x7f3   :  { %v1471_v42 = vpop.eup %1470 }
 0x7f4   :  { %536 = vrot.lane.b32.xlu0 %v1471_v42, %s1632_s12 }
 0x866   :  { %v537_v43 = vpop.permute.xlu0 %536 }
 0x867   :  { %v539_v45 = vmul.f32 %v1469_v32, %v537_v43 }
 0x869   :  { %v540_v46 = vadd.f32 %v539_v45, %v437_v44  ;;  %543 = vrot.lane.b32.xlu1 %v539_v45, %s1624_s1 }
 0x8db   :  { %v544_v47 = vpop.permute.xlu1 %543 }
 0x8dc   :  { %1311 = vmatmul.mubr.msk.f32.vlgmr.msra.gmra.mrb[4].mxu1 %vm234_vm2, %v544_v47 }
 0x8dd   :  { %1416 = vmatpush3.bf16.msra.mxu1 %v1744_v33  ;;  %1332 = vmatprep.mubr.msk.f32.mxu1 %vm1630_vm0, %v1631_v4 }
 0x8de   :  { %1417 = vmatprep.subr.bf16.mxu1 %v1629_v3 }
 0x8e1   :  { %1419 = vmatpush3.bf16.msra.mxu1 %v1747_v39 }
 0x8e2   :  { %1426 = vmatprep.subr.bf16.mxu1 %v1629_v3 }
 0x9af   :  { %v613_v49 = vpop.f32.mrb[4].mxu1 }
 0x9b0   :  { %v617_v50 = vadd.f32 %v613_v49, %v541_v48  ;;  %v1312_v51 = vpop.f32.mrb[5].mxu1 }
 0x9b2   :  { %v1179_v52 = vmul.f32 -1.442695, %v617_v50 }
 0x9b4   :  { %1472 = vpow2.f32 %v1179_v52 }
 0x9be   :  { %v1473_v53 = vpop.eup %1472 }
 0x9bf   :  { %v621_v54 = vadd.f32 1.0, %v1473_v53 }
 0x9c1   :  { %1474 = vrcp.f32 %v621_v54 }
 0x9cb   :  { %v1475_v55 = vpop.eup %1474 }
 0x9cc   :  { %v624_v56 = vmul.f32 2.0, %v1475_v55  ;;  %v626_v60 = vmul.f32 %v1475_v55, %v533_v41 }
 0x9ce   :  { %v1180_v57 = vadd.f32 -1.0, %v624_v56 }
 0x9d0   :  { %628 = vrot.lane.b32.xlu0 %v1180_v57, %s1632_s12 }
 0xa42   :  { %v629_v58 = vpop.permute.xlu0 %628 }
 0xa43   :  { %v631_v59 = vmul.f32 %v1475_v55, %v629_v58 }
 0xa45   :  { %633 = vrot.lane.b32.xlu1 %v631_v59, %s1624_s1 }
 0xab7   :  { %v634_v61 = vpop.permute.xlu1 %633 }
 0xab8   :  { %v636_v62 = vadd.f32 %v634_v61, %v626_v60 }
 0xaba   :  { %1476 = vtanh.f32 %v636_v62 }
 0xac4   :  { %v1477_v63 = vpop.eup %1476 }
 0xac5   :  { %639 = vrot.lane.b32.xlu0 %v1477_v63, %s1632_s12 }
 0xb37   :  { %v640_v0 = vpop.permute.xlu0 %639 }
 0xb38   :  { %v642_v1 = vmul.f32 %v1475_v55, %v640_v0 }
 0xb3a   :  { %v643_v2 = vadd.f32 %v642_v1, %v540_v46  ;;  %646 = vrot.lane.b32.xlu1 %v642_v1, %s1624_s1  ;;  %v850_v46 = vld [vmem:[#allocation2 + $0xc] sm:$0x3]  ;;  %v953_v1 = vld [vmem:[#allocation2 + $0xe] sm:$0x3] }
 0xbac   :  { %v647_v5 = vpop.permute.xlu1 %646 }
 0xbad   :  { %1322 = vmatmul.mubr.msk.f32.vlgmr.msra.gmra.mrb[4].mxu0 %vm234_vm2, %v647_v5 }
 0xbae   :  { %1422 = vmatpush3.bf16.msra.mxu0 %v1744_v33  ;;  %1343 = vmatprep.mubr.msk.f32.mxu0 %vm1630_vm0, %v1631_v4 }
 0xbaf   :  { %1423 = vmatprep.subr.bf16.mxu0 %v1629_v3 }
 0xbb2   :  { %1425 = vmatpush3.bf16.msra.mxu0 %v1747_v39 }
 0xbb3   :  { %1432 = vmatprep.subr.bf16.mxu0 %v1629_v3 }
 0xc80   :  { %v716_v7 = vpop.f32.mrb[4].mxu0 }
 0xc81   :  { %v720_v8 = vadd.f32 %v716_v7, %v644_v6  ;;  %v1323_v9 = vpop.f32.mrb[5].mxu0 }
 0xc83   :  { %v1182_v10 = vmul.f32 -1.442695, %v720_v8 }
 0xc85   :  { %1478 = vpow2.f32 %v1182_v10 }
 0xc8f   :  { %v1479_v11 = vpop.eup %1478 }
 0xc90   :  { %v724_v12 = vadd.f32 1.0, %v1479_v11 }
 0xc92   :  { %1480 = vrcp.f32 %v724_v12 }
 0xc9c   :  { %v1481_v13 = vpop.eup %1480 }
 0xc9d   :  { %v727_v14 = vmul.f32 2.0, %v1481_v13  ;;  %v729_v18 = vmul.f32 %v1481_v13, %v636_v62 }
 0xc9f   :  { %v1183_v15 = vadd.f32 -1.0, %v727_v14  ;;  %v1633_v14 = vmov 0  }
 0xca0   :  { %1453 = vset.pattern.permute.xlu0 %v1633_v14 }
 0xca1   :  { %731 = vrot.lane.b32.xlu0 %v1183_v15, %s1632_s12 }
 0xd13   :  { %v732_v16 = vpop.permute.xlu0 %731 }
 0xd14   :  { %v734_v17 = vmul.f32 %v1481_v13, %v732_v16 }
 0xd16   :  { %736 = vrot.lane.b32.xlu1 %v734_v17, %s1624_s1 }
 0xd88   :  { %v737_v19 = vpop.permute.xlu1 %736 }
 0xd89   :  { %v739_v20 = vadd.f32 %v737_v19, %v729_v18 }
 0xd8b   :  { %1482 = vtanh.f32 %v739_v20 }
 0xd95   :  { %v1483_v21 = vpop.eup %1482 }
 0xd96   :  { %742 = vrot.lane.b32.xlu0 %v1483_v21, %s1632_s12  ;;  %v1064_v21 = vld [vmem:[#allocation9 + $0x8] sm:$0xff] }
 0xe08   :  { %v743_v22 = vpop.permute.xlu0 %742 }
 0xe09   :  { %v745_v23 = vmul.f32 %v1481_v13, %v743_v22  ;;  %v1056_v13 = vld [vmem:[%s1869_s4] sm:$0x3]  ;;  %v1065_v22 = vld [vmem:[#allocation9 + $0x10] sm:$0xff] }
 0xe0b   :  { %v746_v24 = vadd.f32 %v745_v23, %v643_v2  ;;  %749 = vrot.lane.b32.xlu1 %v745_v23, %s1624_s1 }
 0xe7d   :  { %v750_v25 = vpop.permute.xlu1 %749 }
 0xe7e   :  { %1333 = vmatmul.mubr.msk.f32.vlgmr.msra.gmra.mrb[6].mxu1 %vm234_vm2, %v750_v25 }
 0xe7f   :  { %1428 = vmatpush3.bf16.msra.mxu1 %v1744_v33  ;;  %1354 = vmatprep.mubr.msk.f32.mxu1 %vm1630_vm0, %v1631_v4 }
 0xe80   :  { %1429 = vmatprep.subr.bf16.mxu1 %v1629_v3 }
 0xe83   :  { %1431 = vmatpush3.bf16.msra.mxu1 %v1747_v39 }
 0xf51   :  { %v819_v27 = vpop.f32.mrb[6].mxu1 }
 0xf52   :  { %v823_v28 = vadd.f32 %v819_v27, %v747_v26  ;;  %v1334_v29 = vpop.f32.mrb[7].mxu1 }
 0xf54   :  { %v1185_v30 = vmul.f32 -1.442695, %v823_v28 }
 0xf56   :  { %1484 = vpow2.f32 %v1185_v30 }
 0xf60   :  { %v1485_v31 = vpop.eup %1484 }
 0xf61   :  { %v827_v32 = vadd.f32 1.0, %v1485_v31 }
 0xf63   :  { %1486 = vrcp.f32 %v827_v32 }
 0xf6d   :  { %v1487_v34 = vpop.eup %1486 }
 0xf6e   :  { %v830_v35 = vmul.f32 2.0, %v1487_v34  ;;  %v832_v38 = vmul.f32 %v1487_v34, %v739_v20  ;;  %v1063_v20 = vld [vmem:[#allocation9] sm:$0xff] }
 0xf6f   :  { %v1433_v23 = vpack.c.bf16 %v1064_v21, %v1063_v20 }
 0xf70   :  { %v1186_v36 = vadd.f32 -1.0, %v830_v35 }
 0xf72   :  { %834 = vrot.lane.b32.xlu0 %v1186_v36, %s1632_s12 }
 0xfe4   :  { %v835_v33 = vpop.permute.xlu0 %834 }
 0xfe5   :  { %v837_v37 = vmul.f32 %v1487_v34, %v835_v33 }
 0xfe7   :  { %839 = vrot.lane.b32.xlu1 %v837_v37, %s1624_s1 }
0x1059   :  { %v840_v39 = vpop.permute.xlu1 %839 }
0x105a   :  { %v842_v40 = vadd.f32 %v840_v39, %v832_v38 }
0x105c   :  { %1488 = vtanh.f32 %v842_v40 }
0x1066   :  { %v1489_v41 = vpop.eup %1488 }
0x1067   :  { %845 = vrot.lane.b32.xlu0 %v1489_v41, %s1632_s12 }
0x10d9   :  { %v846_v42 = vpop.permute.xlu0 %845 }
0x10da   :  { %v848_v43 = vmul.f32 %v1487_v34, %v846_v42  ;;  %v1193_v34 = vld [vmem:[%s1871_s6] ss:$0 sm:$0xff] }
0x10dc   :  { %v849_v44 = vadd.f32 %v848_v43, %v746_v24  ;;  %852 = vrot.lane.b32.xlu1 %v848_v43, %s1624_s1  ;;  %v1066_v24 = vld [vmem:[#allocation9 + $0x18] sm:$0xff] }
0x10dd   :  { %v1436_v25 = vpack.c.bf16 %v1066_v24, %v1065_v22 }
0x114e   :  { %v853_v45 = vpop.permute.xlu1 %852 }
0x114f   :  { %1344 = vmatmul.mubr.msk.f32.vlgmr.msra.gmra.mrb[6].mxu0 %vm234_vm2, %v853_v45 }
0x1150   :  { %1365 = vmatprep.mubr.msk.f32.mxu0 %vm1630_vm0, %v1631_v4  ;;  %1434 = vmatpush3.bf16.msra.mxu0 %v1433_v23 }
0x1151   :  { %1435 = vmatprep.subr.bf16.mxu0 %v1629_v3 }
0x1154   :  { %1437 = vmatpush3.bf16.msra.mxu0 %v1436_v25 }
0x1222   :  { %v922_v47 = vpop.f32.mrb[6].mxu0 }
0x1223   :  { %v926_v48 = vadd.f32 %v922_v47, %v850_v46  ;;  %v1345_v49 = vpop.f32.mrb[7].mxu0 }
0x1225   :  { %v1188_v50 = vmul.f32 -1.442695, %v926_v48 }
0x1227   :  { %1490 = vpow2.f32 %v1188_v50 }
0x1231   :  { %v1491_v51 = vpop.eup %1490 }
0x1232   :  { %v930_v52 = vadd.f32 1.0, %v1491_v51 }
0x1234   :  { %1492 = vrcp.f32 %v930_v52 }
0x123e   :  { %v1493_v53 = vpop.eup %1492 }
0x123f   :  { %v933_v54 = vmul.f32 2.0, %v1493_v53  ;;  %v935_v58 = vmul.f32 %v1493_v53, %v842_v40 }
0x1241   :  { %v1189_v55 = vadd.f32 -1.0, %v933_v54 }
0x1243   :  { %937 = vrot.lane.b32.xlu0 %v1189_v55, %s1632_s12 }
0x12b5   :  { %v938_v56 = vpop.permute.xlu0 %937 }
0x12b6   :  { %v940_v57 = vmul.f32 %v1493_v53, %v938_v56 }
0x12b8   :  { %942 = vrot.lane.b32.xlu1 %v940_v57, %s1624_s1 }
0x132a   :  { %v943_v4 = vpop.permute.xlu1 %942 }
0x132b   :  { %v945_v59 = vadd.f32 %v943_v4, %v935_v58 }
0x132d   :  { %1494 = vtanh.f32 %v945_v59 }
0x1337   :  { %v1495_v60 = vpop.eup %1494 }
0x1338   :  { %948 = vrot.lane.b32.xlu0 %v1495_v60, %s1632_s12 }
0x13aa   :  { %v949_v61 = vpop.permute.xlu0 %948 }
0x13ab   :  { %v951_v62 = vmul.f32 %v1493_v53, %v949_v61 }
0x13ad   :  { %v952_v63 = vadd.f32 %v951_v62, %v849_v44  ;;  %955 = vrot.lane.b32.xlu1 %v951_v62, %s1624_s1 }
0x141f   :  { %v956_v0 = vpop.permute.xlu1 %955 }
0x1420   :  { %1355 = vmatmul.mubr.msk.f32.vlgmr.msra.gmra.mrb[8].mxu1 %vm234_vm2, %v956_v0 }
0x14f3   :  { %v1025_v2 = vpop.f32.mrb[8].mxu1 }
0x14f4   :  { %v1029_v5 = vadd.f32 %v1025_v2, %v953_v1  ;;  %v1356_v6 = vpop.f32.mrb[9].mxu1 }
0x14f6   :  { %v1191_v7 = vmul.f32 -1.442695, %v1029_v5 }
0x14f8   :  { %1496 = vpow2.f32 %v1191_v7 }
0x1502   :  { %v1497_v8 = vpop.eup %1496 }
0x1503   :  { %v1033_v9 = vadd.f32 1.0, %v1497_v8 }
0x1505   :  { %1498 = vrcp.f32 %v1033_v9 }
0x150f   :  { %v1499_v10 = vpop.eup %1498 }
0x1510   :  { %v1036_v11 = vmul.f32 2.0, %v1499_v10  ;;  %v1038_v17 = vmul.f32 %v1499_v10, %v945_v59 }
0x1512   :  { %v1192_v12 = vadd.f32 -1.0, %v1036_v11 }
0x1514   :  { %1040 = vrot.lane.b32.xlu0 %v1192_v12, %s1632_s12 }
0x1518   :  { %1059 = vperm.xlu0 %1453, %v1056_v13  }
0x1586   :  { %v1041_v15 = vpop.permute.xlu0 %1040 }
0x1587   :  { %v1043_v16 = vmul.f32 %v1499_v10, %v1041_v15 }
0x1589   :  { %1045 = vrot.lane.b32.xlu1 %v1043_v16, %s1624_s1 }
0x1597   :  { %v1060_v29 = vpop.permute.xlu0 %1059 }
0x15fb   :  { %v1046_v18 = vpop.permute.xlu1 %1045 }
0x15fc   :  { %v1048_v19 = vadd.f32 %v1046_v18, %v1038_v17 }
0x15fe   :  { %1500 = vtanh.f32 %v1048_v19 }
0x1608   :  { %v1501_v26 = vpop.eup %1500 }
0x1609   :  { %1051 = vrot.lane.b32.xlu1 %v1501_v26, %s1632_s12 }
0x167b   :  { %v1052_v27 = vpop.permute.xlu1 %1051 }
0x167c   :  { %v1054_v28 = vmul.f32 %v1499_v10, %v1052_v27 }
0x167e   :  { %v1055_v30 = vadd.f32 %v1054_v28, %v952_v63 }
0x1680   :  { %v1062_v31 = vmul.f32 %v1060_v29, %v1055_v30 }
0x1682   :  { %1075 = vrot.lane.b32.xlu1 %v1062_v31, %s1624_s1 }
0x16f4   :  { %v1076_v32 = vpop.permute.xlu1 %1075 }
0x16f5   :  { %1366 = vmatmul.mubr.msk.f32.vlgmr.msra.gmra.mrb[8].mxu0 %vm234_vm2, %v1076_v32 }
0x17c8   :  { %v1145_v3 = vpop.f32.mrb[8].mxu0 }
0x17c9   :  { %v1146_v35 = vadd.f32 %v1193_v34, %v1145_v3  ;;  %v1367_v36 = vpop.f32.mrb[9].mxu0 }
0x17cb   :  { %1149 = vst [vmem:[#allocation11] sm:$0x3] %v1146_v35 }
0x17cc   :  { %1601 = shalt.err (!%p1598_p8)
}
0x17cd   :  { %s1602_s14 = scalar_lea.hbm %s1872_s7, 32 }
0x17ce   :  { %p1603_p9 = scmp.ne.s32.totalorder %s1872_s7, %s1602_s14  ;;  %p1606_p10 = scmp.lt.u32.totalorder %s1602_s14, %s1872_s7 }
0x17d0   :  { %p1608_p11 = pnand %p1606_p10, %p1603_p9 }
0x17d2   :  { %1611 = shalt.err (!%p1608_p11)
}
0x17d3   :  { %1159 = dma.vmem_to_hbm [thread:$0]  %s1157_s9, 32, %s1872_s7, [#allocation5]  }
0x17d4   :  { %1618 = dma.done.wait [#allocation5], 32  }
0x17d5   :  { %1619 = vsyncadd [#allocation5], 4294967264 }
0x17d6   :  { %1163 = vsyncpa [#allocation4], 1 }
0x17d7   :  { %1164 = vsyncpa [#allocation7], 1 }
0x17d8   :  { %1165 = vsyncpa [#allocation10], 1 }
0x17d9   :  { %1166 = vsyncpa [#allocation5], 1 }

</bundles_post_ra>
